<compile_context>
chip_gen: v6e
topology: v6e:2x2x1
jax: 0.10.0
libtpu: 0.0.40
codegen_flags: <defaults>
</compile_context>

<pallas_src>
import jax
import jax.numpy as jnp
import numpy as np
from jax.experimental import pallas as pl
from jax.experimental.pallas import tpu as pltpu


def _vmem_budget_bytes():
    """Cap the whole VMEM plan at ~half of physical VMEM per core.

    v5e/v6e have 128 MiB (-> 64 MiB budget); v7x has only 64 MiB (-> 32 MiB).
    """
    try:
        cap = pltpu.get_tpu_info().vmem_capacity_bytes
    except Exception:
        cap = 64 << 20  # conservative fallback (assume v7x-sized VMEM)
    return max(16 << 20, min(cap // 2, 64 << 20))


def _choose_tile_b(b, c, itemsize, budget):
    """Largest row tile (<=2048, multiple of 8) whose budgeted footprint fits.

    Footprint per row of tile: 2x double-buffered logits block (native dtype)
    + in-kernel temporaries (int32 column iota, compare mask, where()'d copy),
    all counted conservatively at 4 bytes/elem for the int/mask temporaries.
    """
    if b <= 8:
        return b
    per_row = c * (2 * itemsize + 4 + 4 + itemsize)
    tile = 2048
    while tile > 8 and tile * per_row > (2 * budget) // 3:
        tile //= 2
    if b <= tile:
        return b  # single tile; block dims equal full dims (no (8,·) constraint)
    return tile   # power of two >= 8 -> valid sublane tiling


# --------------------------------------------------------------------------- #
# Fused kernel: one pass over the logits tile.
#   partial[i] = base[i] + coef[i] * logits[i, t_i]
#   row_max[i] = max_j logits[i, j]
# --------------------------------------------------------------------------- #
def _bsm_fused_kernel(x_ref, t_ref, base_ref, coef_ref, partial_ref, rmax_ref):
    x = x_ref[...]                                      # (TB, C) logits, native dtype
    t = t_ref[...]                                      # (TB, 1) int32 targets
    tb, num_c = x.shape

    # Single masked lane-reduce in the native dtype: x_sel[i] = logits[i, t_i].
    col = jax.lax.broadcasted_iota(jnp.int32, (tb, num_c), 1)
    neg_inf = jnp.asarray(-jnp.inf, dtype=x.dtype)
    x_sel = jnp.max(jnp.where(col == t, x, neg_inf), axis=1, keepdims=True)
    x_sel = x_sel.astype(jnp.float32)                   # upcast only the column

    # Per-row max feeding the global-max epilogue (tiny HBM writeback).
    rmax_ref[...] = jnp.max(x, axis=1, keepdims=True).astype(jnp.float32)

    # All weight math was hoisted to the wrapper; only a (TB,1) FMA remains.
    partial_ref[...] = base_ref[...] + coef_ref[...] * x_sel


def bsm_loss(logits, target, loss_weights, class_weights, *, tile_b=None):
    b, c = logits.shape
    assert b == c, "BSMLoss forward only broadcasts correctly when batch == num_classes"

    lw = loss_weights.astype(jnp.float32).reshape(c)
    cw = class_weights.astype(jnp.float32).reshape(c)
    tgt = target.astype(jnp.int32).reshape(b)

    # O(B) XLA gathers (PyTorch's target_weight & friends), hoisted out of the
    # kernel.  log-ratio by subtraction of a precomputed log(loss_weights)
    # keeps divide/log off the per-tile path entirely.
    log_lw = jnp.log(lw)
    log_ratio = log_lw[tgt[tgt]] - log_lw[tgt]          # log(lw[tgt[tgt]] / lw[tgt])
    cw_t = cw[tgt]                                       # class_weights[target]
    base = (-cw_t * log_ratio).reshape(b, 1).astype(jnp.float32)
    coef = (2.0 * cw_t).reshape(b, 1).astype(jnp.float32)

    budget = _vmem_budget_bytes()
    if tile_b is None:
        tile_b = _choose_tile_b(b, c, jnp.dtype(logits.dtype).itemsize, budget)
    num_tiles = pl.cdiv(b, tile_b)                      # ragged last tile handled by Pallas

    partial, rmax = pl.pallas_call(
        _bsm_fused_kernel,
        out_shape=(jax.ShapeDtypeStruct((b, 1), jnp.float32),
                   jax.ShapeDtypeStruct((b, 1), jnp.float32)),
        grid=(num_tiles,),
        in_specs=[
            pl.BlockSpec((tile_b, c), lambda i: (i, 0)),   # logits tile (native dtype)
            pl.BlockSpec((tile_b, 1), lambda i: (i, 0)),   # target column
            pl.BlockSpec((tile_b, 1), lambda i: (i, 0)),   # base = -cw_t*log_ratio
            pl.BlockSpec((tile_b, 1), lambda i: (i, 0)),   # coef = 2*cw_t
        ],
        out_specs=(pl.BlockSpec((tile_b, 1), lambda i: (i, 0)),   # partial
                   pl.BlockSpec((tile_b, 1), lambda i: (i, 0))),  # per-row max
        compiler_params=pltpu.CompilerParams(
            dimension_semantics=("parallel",),          # every output block is per-tile
            vmem_limit_bytes=budget),
    )(logits, tgt.reshape(b, 1), base, coef)

    # Tiny O(B) epilogue: global max + affine finish.
    c_max = jnp.max(rmax)
    return partial.reshape(b) - coef.reshape(b) * c_max


def bsm_loss_ref(logits, target, loss_weights, class_weights):
    """Pure-JAX transcription of the PyTorch forward, for verification."""
    b = logits.shape[0]
    c = logits.max()
    diff = logits - c
    target_weight = loss_weights[target]                                  # (B,)
    logsumexp = jnp.log(loss_weights * jnp.exp(diff))                     # (B, C)
    log_probs = jnp.repeat(jnp.log(target_weight)[None, :], b, axis=0) - diff - logsumexp
    sel = log_probs[:, target]                                            # index_select(-1, target)
    d = jnp.diagonal(sel)                                                 # .diag()
    return -class_weights[target] * d


if __name__ == "__main__":
    # Primary check: small square case (forward requires batch == num_classes).
    B = C = 8
    key = jax.random.PRNGKey(0)
    k1, k2, k3, k4 = jax.random.split(key, 4)
    logits = jax.random.normal(k1, (B, C), dtype=jnp.float32)
    target = jax.random.randint(k2, (B,), 0, C, dtype=jnp.int32)
    # deterministic, strictly positive weights (log is taken on them)
    loss_weights = jax.nn.softmax(jax.random.normal(k3, (C,), dtype=jnp.float32))
    class_weights = jnp.abs(jax.random.normal(k4, (C,), dtype=jnp.float32)) + 0.5

    out = jax.block_until_ready(bsm_loss(logits, target, loss_weights, class_weights))
    ref = bsm_loss_ref(logits, target, loss_weights, class_weights)
    np.testing.assert_allclose(np.asarray(out), np.asarray(ref), rtol=1e-5, atol=1e-5)
    assert out.shape == (B,)

    # Secondary check: multi-tile + ragged last tile (B=24 rows, forced 16-row tile).
    B2 = C2 = 24
    j1, j2, j3, j4 = jax.random.split(jax.random.PRNGKey(0), 4)
    logits2 = jax.random.normal(j1, (B2, C2), dtype=jnp.float32)
    target2 = jax.random.randint(j2, (B2,), 0, C2, dtype=jnp.int32)
    loss_weights2 = jax.nn.softmax(jax.random.normal(j3, (C2,), dtype=jnp.float32))
    class_weights2 = jnp.abs(jax.random.normal(j4, (C2,), dtype=jnp.float32)) + 0.5

    out2 = jax.block_until_ready(
        bsm_loss(logits2, target2, loss_weights2, class_weights2, tile_b=16))
    ref2 = bsm_loss_ref(logits2, target2, loss_weights2, class_weights2)
    np.testing.assert_allclose(np.asarray(out2), np.asarray(ref2), rtol=1e-5, atol=1e-5)

    print("KERNEL_OK")
</pallas_src>

<mosaic_0001>
module attributes {stable_mosaic.version = 11 : i64} {
  func.func @_bsm_fused_kernel(%arg0: i32, %arg1: memref<8x8xf32, #tpu.memory_space<vmem>>, %arg2: memref<8x1xi32, #tpu.memory_space<vmem>>, %arg3: memref<8x1xf32, #tpu.memory_space<vmem>>, %arg4: memref<8x1xf32, #tpu.memory_space<vmem>>, %arg5: memref<8x1xf32, #tpu.memory_space<vmem>>, %arg6: memref<8x1xf32, #tpu.memory_space<vmem>>) attributes {dimension_semantics = [#tpu.dimension_semantics<parallel>], iteration_bounds = array<i64: 1>, scalar_prefetch = 0 : i64, scratch_operands = 0 : i64, tpu.core_type = #tpu.core_type<tc>, window_params = [{transform_indices = @transform_0, window_bounds = array<i64: 8, 8>}, {transform_indices = @transform_1, window_bounds = array<i64: 8, 1>}, {transform_indices = @transform_2, window_bounds = array<i64: 8, 1>}, {transform_indices = @transform_3, window_bounds = array<i64: 8, 1>}, {transform_indices = @transform_4, window_bounds = array<i64: 8, 1>}, {transform_indices = @transform_5, window_bounds = array<i64: 8, 1>}]} {
    %c0 = arith.constant 0 : index
    %c0_0 = arith.constant 0 : index
    %0 = vector.load %arg1[%c0, %c0_0] : memref<8x8xf32, #tpu.memory_space<vmem>>, vector<8x8xf32>
    %c0_1 = arith.constant 0 : index
    %c0_2 = arith.constant 0 : index
    %1 = vector.load %arg2[%c0_1, %c0_2] : memref<8x1xi32, #tpu.memory_space<vmem>>, vector<8x1xi32>
    %2 = tpu.iota {dimensions = array<i32: 1>} : vector<8x8xi32>
    %3 = vector.broadcast %1 : vector<8x1xi32> to vector<8x8xi32>
    %4 = arith.cmpi eq, %2, %3 : vector<8x8xi32>
    %cst = arith.constant 0xFF800000 : f32
    %5 = vector.broadcast %cst : f32 to vector<8x8xf32>
    %6 = arith.select %4, %0, %5 : vector<8x8xi1>, vector<8x8xf32>
    %cst_3 = arith.constant dense<0xFF800000> : vector<8xf32>
    %7 = vector.multi_reduction <maximumf>, %6, %cst_3 [1] : vector<8x8xf32> to vector<8xf32>
    %8 = vector.shape_cast %7 : vector<8xf32> to vector<8x1xf32>
    %cst_4 = arith.constant dense<0xFF800000> : vector<8xf32>
    %9 = vector.multi_reduction <maximumf>, %0, %cst_4 [1] : vector<8x8xf32> to vector<8xf32>
    %10 = vector.shape_cast %9 : vector<8xf32> to vector<8x1xf32>
    %c0_5 = arith.constant 0 : index
    %c0_6 = arith.constant 0 : index
    %11 = vector.load %arg6[%c0_5, %c0_6] : memref<8x1xf32, #tpu.memory_space<vmem>>, vector<8x1xf32>
    tpu.vector_store %arg6[%c0_5, %c0_6], %10 {strides = array<i32>} : memref<8x1xf32, #tpu.memory_space<vmem>>, vector<8x1xf32>,
    %c0_7 = arith.constant 0 : index
    %c0_8 = arith.constant 0 : index
    %12 = vector.load %arg3[%c0_7, %c0_8] : memref<8x1xf32, #tpu.memory_space<vmem>>, vector<8x1xf32>
    %c0_9 = arith.constant 0 : index
    %c0_10 = arith.constant 0 : index
    %13 = vector.load %arg4[%c0_9, %c0_10] : memref<8x1xf32, #tpu.memory_space<vmem>>, vector<8x1xf32>
    %14 = arith.mulf %13, %8 : vector<8x1xf32>
    %15 = arith.addf %12, %14 : vector<8x1xf32>
    %c0_11 = arith.constant 0 : index
    %c0_12 = arith.constant 0 : index
    %16 = vector.load %arg5[%c0_11, %c0_12] : memref<8x1xf32, #tpu.memory_space<vmem>>, vector<8x1xf32>
    tpu.vector_store %arg5[%c0_11, %c0_12], %15 {strides = array<i32>} : memref<8x1xf32, #tpu.memory_space<vmem>>, vector<8x1xf32>,
    return
  }
  func.func @transform_0(%arg0: i32) -> (i32, i32) {
    %c0_i32 = arith.constant 0 : i32
    %c0_i32_0 = arith.constant 0 : i32
    return %arg0, %c0_i32 : i32, i32
  }
  func.func @transform_1(%arg0: i32) -> (i32, i32) {
    %c0_i32 = arith.constant 0 : i32
    %c0_i32_0 = arith.constant 0 : i32
    return %arg0, %c0_i32 : i32, i32
  }
  func.func @transform_2(%arg0: i32) -> (i32, i32) {
    %c0_i32 = arith.constant 0 : i32
    %c0_i32_0 = arith.constant 0 : i32
    return %arg0, %c0_i32 : i32, i32
  }
  func.func @transform_3(%arg0: i32) -> (i32, i32) {
    %c0_i32 = arith.constant 0 : i32
    %c0_i32_0 = arith.constant 0 : i32
    return %arg0, %c0_i32 : i32, i32
  }
  func.func @transform_4(%arg0: i32) -> (i32, i32) {
    %c0_i32 = arith.constant 0 : i32
    %c0_i32_0 = arith.constant 0 : i32
    return %arg0, %c0_i32 : i32, i32
  }
  func.func @transform_5(%arg0: i32) -> (i32, i32) {
    %c0_i32 = arith.constant 0 : i32
    %c0_i32_0 = arith.constant 0 : i32
    return %arg0, %c0_i32 : i32, i32
  }
}

</mosaic_0001>

<bundles_post_ra>
// kernel: tpu_custom_call.1
= control target key start
LH: loop header
LB: loop body
LE: loop exit
PB: predicated region body
PF: predicated region fallthrough
CT: control target
= control target key end

     0   :  { %v52_v0 = vmov 0   ;;  %vm28_vm0 = vcmask 64512   ;;  %v21_v4 = vlaneseq  ;;  %vm35_vm2 = vcmask 7168   ;;  %s101_s1 = inlined_call_operand.vmem [shape: s32[8,1], index: 1, kind: input, shape index: {}]   ;;  %s102_s0 = inlined_call_operand.vmem [shape: f32[8,8], index: 0, kind: input, shape index: {}]   ;;  %s103_s5 = inlined_call_operand.vmem [shape: f32[8,1], index: 5, kind: output, shape index: {1}]   ;;  %s104_s3 = inlined_call_operand.vmem [shape: f32[8,1], index: 3, kind: input, shape index: {}]   ;;  %s105_s2 = inlined_call_operand.vmem [shape: f32[8,1], index: 2, kind: input, shape index: {}]   ;;  %s106_s4 = inlined_call_operand.vmem [shape: f32[8,1], index: 4, kind: output, shape index: {0}]  }
   0x1   :  { %51 = vset.pattern.permute.xlu0 %v52_v0  ;;  %v20_v1 = vld [vmem:[%s101_s1] sm:$0xff] }
   0x2   :  { %v19_v2 = vld [vmem:[%s102_s0] sm:$0xff]  ;;  %24 = vperm.xlu0 %51, %v20_v1   ;;  %v22_v5 = vand.u32 127, %v21_v4 }
   0x3   :  { %v32_v3 = vsel %vm28_vm0, %v19_v2, -inf  ;;  %v38_v10 = vld [vmem:[%s104_s3] sm:$0xff] }
   0x4   :  { %33 = vmax.xlane.f32.xlu1 %v32_v3  ;;  %v37_v11 = vld [vmem:[%s105_s2] sm:$0xff] }
  0x7d   :  { %v25_v6 = vpop.permute.xlu0 %24 }
  0x7e   :  { %vm26_vm1 = vcmp.eq.s32.totalorder %v22_v5, %v25_v6 }
  0x7f   :  { %v27_v7 = vsel %vm26_vm1, %v19_v2, -inf }
  0x80   :  { %v29_v8 = vsel %vm28_vm0, %v27_v7, -inf }
  0x81   :  { %30 = vmax.xlane.f32.xlu0 %v29_v8 }
  0x8d   :  { %v34_v9 = vpop.xlane.xlu1 %33 }
  0x8e   :  { %36 = vst.msk [vmem:[%s103_s5] sm:$0xff] %vm35_vm2, %v34_v9 }
 0x10a   :  { %v31_v12 = vpop.xlane.xlu0 %30 }
 0x10b   :  { %v39_v13 = vmul.f32 %v38_v10, %v31_v12 }
 0x10d   :  { %v40_v14 = vadd.f32 %v39_v13, %v37_v11 }
 0x10f   :  { %41 = vst.msk [vmem:[%s106_s4] sm:$0xff] %vm35_vm2, %v40_v14 }

</bundles_post_ra>
